<compile_context>
chip_gen: v7x
topology: tpu7x:2x2x1
jax: 0.10.0
libtpu: 0.0.40
codegen_flags: <defaults>
</compile_context>

<pallas_src>
import functools

import jax
import jax.numpy as jnp
from jax.experimental import pallas as pl
from jax.experimental.pallas import tpu as pltpu


def _int_pow(x, k):
    """x**k for small non-negative integer k, unrolled at trace time (VPU only)."""
    result = None
    base = x
    while k > 0:
        if k & 1:
            result = base if result is None else result * base
        k >>= 1
        if k:
            base = base * base
    return jnp.ones_like(x) if result is None else result


def _focal_loss_kernel(x_ref, lab_ref, loss_ref, cnt_ref, *,
                       gamma, ignore_lb, hw, tile_p):
    p = pl.program_id(1)

    # Output blocks are resident across the pixel-tile (reduction) axis:
    # initialize them on the first pixel tile of each batch element.
    @pl.when(p == 0)
    def _():
        loss_ref[...] = jnp.zeros_like(loss_ref)
        cnt_ref[...] = jnp.zeros_like(cnt_ref)

    x = x_ref[...].astype(jnp.float32)       # (1, C, T): channels=sublanes, pixels=lanes
    lab = lab_ref[...]                       # (1, 1, T) int32

    # Numerically stable softmax pieces over the channel axis (axis=1).
    m = jnp.max(x, axis=1, keepdims=True)    # (1, 1, T)
    z = x - m
    ez = jnp.exp(z)                          # the only EUP op over the full (C,T) block
    se = jnp.sum(ez, axis=1, keepdims=True)  # (1, 1, T)

    # Select the label channel FIRST (one-hot over sublanes), then apply the focal factor.
    ch = jax.lax.broadcasted_iota(jnp.int32, x.shape, 1)
    onehot = ch == lab                                                   # (1, C, T)
    z_lab = jnp.sum(jnp.where(onehot, z, 0.0), axis=1, keepdims=True)    # (1, 1, T)
    ez_lab = jnp.sum(jnp.where(onehot, ez, 0.0), axis=1, keepdims=True)  # (1, 1, T)

    log_sm_lab = z_lab - jnp.log(se)                     # log_softmax at the label
    sm_lab = ez_lab * pl.reciprocal(se, approx=False)    # softmax at the label
    one_minus = jnp.maximum(1.0 - sm_lab, 0.0)           # guard pow against tiny negatives

    g = float(gamma)
    if g == int(g) and 0 <= int(g) <= 8:
        factor = _int_pow(one_minus, int(g))             # pure VPU for integer gamma
    else:
        factor = jnp.power(one_minus, jnp.float32(g))    # general (non-integer) gamma

    per_pixel = -factor * log_sm_lab                     # (1, 1, T)

    # Validity: in-bounds pixel of the (possibly ragged) last tile AND label != ignore.
    pix = jax.lax.broadcasted_iota(jnp.int32, lab.shape, 2) + p * tile_p
    valid = (lab != jnp.int32(ignore_lb)) & (pix < hw)

    # Lane-dense accumulation into the resident output blocks (no per-step scalar reduce).
    loss_ref[...] += jnp.where(valid, per_pixel, 0.0)
    cnt_ref[...] += valid.astype(jnp.float32)


def _pick_tile_p(hw, c, itemsize, budget_bytes=4 << 20, max_tile=2048):
    """Largest pixel tile (multiple of 128, or the full HW) whose double-buffered
    logits block stays within a conservative VMEM budget (safe on v5e/v6e/v7x)."""
    if hw <= 128:
        return hw
    per_lane = 2 * c * itemsize                      # double-buffered logits bytes / pixel
    fit = max(budget_bytes // per_lane, 128)
    tile = min(hw, max_tile, fit)
    if tile >= hw:
        return hw                                    # one full-extent tile
    return max((tile // 128) * 128, 128)


def softmax_focal_loss(logits, labels, *, gamma=2.0, ignore_lb=255):
    """logits: (N, C, H, W) float; labels: (N, H, W) int. Returns scalar mean loss."""
    N, C, H, W = logits.shape
    HW = H * W

    # Free reshapes only: stay in NCHW-contiguous order, no transpose / astype / pad pass.
    x = logits.reshape(N, C, HW)
    lab = labels.reshape(N, 1, HW).astype(jnp.int32)

    tile_p = _pick_tile_p(HW, C, jnp.dtype(logits.dtype).itemsize)
    n_tiles = pl.cdiv(HW, tile_p)

    kernel = functools.partial(
        _focal_loss_kernel, gamma=gamma, ignore_lb=ignore_lb, hw=HW, tile_p=tile_p
    )

    loss_parts, cnt_parts = pl.pallas_call(
        kernel,
        out_shape=(
            jax.ShapeDtypeStruct((N, 1, tile_p), jnp.float32),
            jax.ShapeDtypeStruct((N, 1, tile_p), jnp.float32),
        ),
        grid_spec=pltpu.PrefetchScalarGridSpec(
            num_scalar_prefetch=0,
            grid=(N, n_tiles),
            in_specs=[
                pl.BlockSpec((1, C, tile_p), lambda n, p: (n, 0, p)),
                pl.BlockSpec((1, 1, tile_p), lambda n, p: (n, 0, p)),
            ],
            out_specs=(
                pl.BlockSpec((1, 1, tile_p), lambda n, p: (n, 0, 0)),
                pl.BlockSpec((1, 1, tile_p), lambda n, p: (n, 0, 0)),
            ),
        ),
        compiler_params=pltpu.CompilerParams(
            # batch axis is independent (megacore-shardable on v7x),
            # pixel-tile axis is the accumulation/reduction axis.
            dimension_semantics=("parallel", "arbitrary"),
        ),
    )(x, lab)

    # nn.NLLLoss(reduction='mean'): sum over valid pixels / number of valid pixels.
    return jnp.sum(loss_parts) / jnp.sum(cnt_parts)


def _reference_focal_loss(logits, labels, *, gamma=2.0, ignore_lb=255):
    """Pure-JAX reference matching the PyTorch module."""
    x = logits.astype(jnp.float32)
    sm = jax.nn.softmax(x, axis=1)
    log_sm = jax.nn.log_softmax(x, axis=1)
    log_score = jnp.power(1.0 - sm, gamma) * log_sm          # (N, C, H, W)
    lab = labels.astype(jnp.int32)
    valid = lab != ignore_lb
    safe_lab = jnp.where(valid, lab, 0)
    picked = jnp.take_along_axis(log_score, safe_lab[:, None, :, :], axis=1)[:, 0]
    picked = jnp.where(valid, -picked, 0.0)
    return jnp.sum(picked) / jnp.sum(valid.astype(jnp.float32))


if __name__ == "__main__":
    # Deterministic small example: N=2, C=4 classes, 16x16 spatial.
    key = jax.random.PRNGKey(0)
    k_logits, k_labels, k_ignore = jax.random.split(key, 3)

    N, C, H, W = 2, 4, 16, 16
    logits = jax.random.normal(k_logits, (N, C, H, W), dtype=jnp.float32)
    labels = jax.random.randint(k_labels, (N, H, W), 0, C, dtype=jnp.int32)
    # Sprinkle some ignore_index=255 pixels to exercise the mask path.
    ignore_mask = jax.random.bernoulli(k_ignore, 0.1, (N, H, W))
    labels = jnp.where(ignore_mask, jnp.int32(255), labels)

    loss = softmax_focal_loss(logits, labels, gamma=2.0, ignore_lb=255)
    loss = jax.block_until_ready(loss)

    ref = _reference_focal_loss(logits, labels, gamma=2.0, ignore_lb=255)
    assert jnp.allclose(loss, ref, rtol=1e-5, atol=1e-6), (loss, ref)

    print("KERNEL_OK")
</pallas_src>

<mosaic_0001>
module attributes {stable_mosaic.version = 11 : i64} {
  func.func @_focal_loss_kernel(%arg0: i32, %arg1: i32, %arg2: memref<1x4x256xf32, #tpu.memory_space<vmem>>, %arg3: memref<1x1x256xi32, #tpu.memory_space<vmem>>, %arg4: memref<1x1x256xf32, #tpu.memory_space<vmem>>, %arg5: memref<1x1x256xf32, #tpu.memory_space<vmem>>) attributes {dimension_semantics = [#tpu.dimension_semantics<parallel>, #tpu.dimension_semantics<arbitrary>], iteration_bounds = array<i64: 2, 1>, scalar_prefetch = 0 : i64, scratch_operands = 0 : i64, tpu.core_type = #tpu.core_type<tc>, window_params = [{transform_indices = @transform_0, window_bounds = array<i64: 1, 4, 256>}, {transform_indices = @transform_1, window_bounds = array<i64: 1, 1, 256>}, {transform_indices = @transform_2, window_bounds = array<i64: 1, 1, 256>}, {transform_indices = @transform_3, window_bounds = array<i64: 1, 1, 256>}]} {
    %c0_i32 = arith.constant 0 : i32
    %0 = arith.cmpi eq, %arg1, %c0_i32 : i32
    %1 = arith.extui %0 : i1 to i32
    %c0_i32_0 = arith.constant 0 : i32
    %2 = arith.cmpi ne, %1, %c0_i32_0 : i32
    scf.if %2 {
      %cst_28 = arith.constant 0.000000e+00 : f32
      %54 = vector.broadcast %cst_28 : f32 to vector<1x1x256xf32>
      %c0_29 = arith.constant 0 : index
      %c0_30 = arith.constant 0 : index
      %c0_31 = arith.constant 0 : index
      %55 = vector.load %arg4[%c0_29, %c0_30, %c0_31] : memref<1x1x256xf32, #tpu.memory_space<vmem>>, vector<1x1x256xf32>
      tpu.vector_store %arg4[%c0_29, %c0_30, %c0_31], %54 {strides = array<i32>} : memref<1x1x256xf32, #tpu.memory_space<vmem>>, vector<1x1x256xf32>,
      %cst_32 = arith.constant 0.000000e+00 : f32
      %56 = vector.broadcast %cst_32 : f32 to vector<1x1x256xf32>
      %c0_33 = arith.constant 0 : index
      %c0_34 = arith.constant 0 : index
      %c0_35 = arith.constant 0 : index
      %57 = vector.load %arg5[%c0_33, %c0_34, %c0_35] : memref<1x1x256xf32, #tpu.memory_space<vmem>>, vector<1x1x256xf32>
      tpu.vector_store %arg5[%c0_33, %c0_34, %c0_35], %56 {strides = array<i32>} : memref<1x1x256xf32, #tpu.memory_space<vmem>>, vector<1x1x256xf32>,
    } else {
    }
    %c0 = arith.constant 0 : index
    %c0_1 = arith.constant 0 : index
    %c0_2 = arith.constant 0 : index
    %3 = vector.load %arg2[%c0, %c0_1, %c0_2] : memref<1x4x256xf32, #tpu.memory_space<vmem>>, vector<1x4x256xf32>
    %c0_3 = arith.constant 0 : index
    %c0_4 = arith.constant 0 : index
    %c0_5 = arith.constant 0 : index
    %4 = vector.load %arg3[%c0_3, %c0_4, %c0_5] : memref<1x1x256xi32, #tpu.memory_space<vmem>>, vector<1x1x256xi32>
    %cst = arith.constant dense<0xFF800000> : vector<1x256xf32>
    %5 = vector.multi_reduction <maximumf>, %3, %cst [1] : vector<1x4x256xf32> to vector<1x256xf32>
    %6 = vector.shape_cast %5 : vector<1x256xf32> to vector<1x1x256xf32>
    %7 = vector.broadcast %6 : vector<1x1x256xf32> to vector<1x4x256xf32>
    %8 = arith.subf %3, %7 : vector<1x4x256xf32>
    %9 = math.exp %8 : vector<1x4x256xf32>
    %cst_6 = arith.constant dense<0.000000e+00> : vector<1x256xf32>
    %10 = vector.multi_reduction <add>, %9, %cst_6 [1] : vector<1x4x256xf32> to vector<1x256xf32>
    %11 = vector.shape_cast %10 : vector<1x256xf32> to vector<1x1x256xf32>
    %12 = tpu.iota {dimensions = array<i32: 1>} : vector<1x4x256xi32>
    %13 = vector.broadcast %4 : vector<1x1x256xi32> to vector<1x4x256xi32>
    %14 = arith.cmpi eq, %12, %13 : vector<1x4x256xi32>
    %cst_7 = arith.constant 0.000000e+00 : f32
    %15 = vector.broadcast %cst_7 : f32 to vector<1x4x256xf32>
    %16 = arith.select %14, %8, %15 : vector<1x4x256xi1>, vector<1x4x256xf32>
    %cst_8 = arith.constant dense<0.000000e+00> : vector<1x256xf32>
    %17 = vector.multi_reduction <add>, %16, %cst_8 [1] : vector<1x4x256xf32> to vector<1x256xf32>
    %18 = vector.shape_cast %17 : vector<1x256xf32> to vector<1x1x256xf32>
    %cst_9 = arith.constant 0.000000e+00 : f32
    %19 = vector.broadcast %cst_9 : f32 to vector<1x4x256xf32>
    %20 = arith.select %14, %9, %19 : vector<1x4x256xi1>, vector<1x4x256xf32>
    %cst_10 = arith.constant dense<0.000000e+00> : vector<1x256xf32>
    %21 = vector.multi_reduction <add>, %20, %cst_10 [1] : vector<1x4x256xf32> to vector<1x256xf32>
    %22 = vector.shape_cast %21 : vector<1x256xf32> to vector<1x1x256xf32>
    %23 = math.log %11 : vector<1x1x256xf32>
    %24 = arith.subf %18, %23 : vector<1x1x256xf32>
    %25 = tpu.reciprocal %11 : vector<1x1x256xf32> -> vector<1x1x256xf32>
    %26 = arith.mulf %22, %25 : vector<1x1x256xf32>
    %cst_11 = arith.constant 1.000000e+00 : f32
    %27 = vector.broadcast %cst_11 : f32 to vector<1x1x256xf32>
    %28 = arith.subf %27, %26 : vector<1x1x256xf32>
    %cst_12 = arith.constant 0.000000e+00 : f32
    %29 = vector.broadcast %cst_12 : f32 to vector<1x1x256xf32>
    %30 = arith.maximumf %28, %29 : vector<1x1x256xf32>
    %31 = arith.mulf %30, %30 : vector<1x1x256xf32>
    %cst_13 = arith.constant 0.000000e+00 : f32
    %32 = vector.broadcast %cst_13 : f32 to vector<1x1x256xf32>
    %33 = arith.subf %32, %31 : vector<1x1x256xf32>
    %34 = arith.mulf %33, %24 : vector<1x1x256xf32>
    %35 = tpu.iota {dimensions = array<i32: 2>} : vector<1x1x256xi32>
    %c256_i32 = arith.constant 256 : i32
    %36 = arith.muli %arg1, %c256_i32 : i32
    %37 = vector.broadcast %36 : i32 to vector<1x1x256xi32>
    %38 = arith.addi %35, %37 : vector<1x1x256xi32>
    %c255_i32 = arith.constant 255 : i32
    %39 = vector.broadcast %c255_i32 : i32 to vector<1x1x256xi32>
    %40 = arith.cmpi ne, %4, %39 : vector<1x1x256xi32>
    %c256_i32_14 = arith.constant 256 : i32
    %41 = vector.broadcast %c256_i32_14 : i32 to vector<1x1x256xi32>
    %42 = arith.cmpi slt, %38, %41 : vector<1x1x256xi32>
    %43 = arith.andi %40, %42 : vector<1x1x256xi1>
    %c0_15 = arith.constant 0 : index
    %c0_16 = arith.constant 0 : index
    %c0_17 = arith.constant 0 : index
    %44 = vector.load %arg4[%c0_15, %c0_16, %c0_17] : memref<1x1x256xf32, #tpu.memory_space<vmem>>, vector<1x1x256xf32>
    %cst_18 = arith.constant 0.000000e+00 : f32
    %45 = vector.broadcast %cst_18 : f32 to vector<1x1x256xf32>
    %46 = arith.select %43, %34, %45 : vector<1x1x256xi1>, vector<1x1x256xf32>
    %47 = arith.addf %44, %46 : vector<1x1x256xf32>
    %c0_19 = arith.constant 0 : index
    %c0_20 = arith.constant 0 : index
    %c0_21 = arith.constant 0 : index
    %48 = vector.load %arg4[%c0_19, %c0_20, %c0_21] : memref<1x1x256xf32, #tpu.memory_space<vmem>>, vector<1x1x256xf32>
    tpu.vector_store %arg4[%c0_19, %c0_20, %c0_21], %47 {strides = array<i32>} : memref<1x1x256xf32, #tpu.memory_space<vmem>>, vector<1x1x256xf32>,
    %c0_22 = arith.constant 0 : index
    %c0_23 = arith.constant 0 : index
    %c0_24 = arith.constant 0 : index
    %49 = vector.load %arg5[%c0_22, %c0_23, %c0_24] : memref<1x1x256xf32, #tpu.memory_space<vmem>>, vector<1x1x256xf32>
    %50 = arith.extui %43 : vector<1x1x256xi1> to vector<1x1x256xi32>
    %51 = arith.sitofp %50 : vector<1x1x256xi32> to vector<1x1x256xf32>
    %52 = arith.addf %49, %51 : vector<1x1x256xf32>
    %c0_25 = arith.constant 0 : index
    %c0_26 = arith.constant 0 : index
    %c0_27 = arith.constant 0 : index
    %53 = vector.load %arg5[%c0_25, %c0_26, %c0_27] : memref<1x1x256xf32, #tpu.memory_space<vmem>>, vector<1x1x256xf32>
    tpu.vector_store %arg5[%c0_25, %c0_26, %c0_27], %52 {strides = array<i32>} : memref<1x1x256xf32, #tpu.memory_space<vmem>>, vector<1x1x256xf32>,
    return
  }
  func.func @transform_0(%arg0: i32, %arg1: i32) -> (i32, i32, i32) {
    %c0_i32 = arith.constant 0 : i32
    %c0_i32_0 = arith.constant 0 : i32
    return %arg0, %c0_i32, %arg1 : i32, i32, i32
  }
  func.func @transform_1(%arg0: i32, %arg1: i32) -> (i32, i32, i32) {
    %c0_i32 = arith.constant 0 : i32
    %c0_i32_0 = arith.constant 0 : i32
    return %arg0, %c0_i32, %arg1 : i32, i32, i32
  }
  func.func @transform_2(%arg0: i32, %arg1: i32) -> (i32, i32, i32) {
    %c0_i32 = arith.constant 0 : i32
    %c0_i32_0 = arith.constant 0 : i32
    %c0_i32_1 = arith.constant 0 : i32
    return %arg0, %c0_i32, %c0_i32_0 : i32, i32, i32
  }
  func.func @transform_3(%arg0: i32, %arg1: i32) -> (i32, i32, i32) {
    %c0_i32 = arith.constant 0 : i32
    %c0_i32_0 = arith.constant 0 : i32
    %c0_i32_1 = arith.constant 0 : i32
    return %arg0, %c0_i32, %c0_i32_0 : i32, i32, i32
  }
}

</mosaic_0001>

<bundles_post_ra>
// kernel: tpu_custom_call.1
= control target key start
LH: loop header
LB: loop body
LE: loop exit
PB: predicated region body
PF: predicated region fallthrough
CT: control target
= control target key end

     0   :  { %9 = vsyncpa [#allocation3], 0  ;;  %s1234_s0 = inlined_call_operand.hbm [shape: f32[2,4,256], index: 0, kind: input, shape index: {}]   ;;  %s1235_s1 = inlined_call_operand.hbm [shape: s32[2,1,256], index: 1, kind: input, shape index: {}]   ;;  %s1236_s2 = inlined_call_operand.hbm [shape: f32[2,1,256], index: 2, kind: output, shape index: {0}]   ;;  %s1237_s3 = inlined_call_operand.hbm [shape: f32[2,1,256], index: 3, kind: output, shape index: {1}]  }
   0x1   :  { %11 = vsyncpa [#allocation3 + $0x1], 0 }
   0x2   :  { %12 = vsyncpa [#allocation6], 0 }
   0x3   :  { %14 = vsyncpa [#allocation6 + $0x1], 0 }
   0x4   :  { %15 = vsyncpa [#allocation4], 0 }
   0x5   :  { %17 = vsyncpa [#allocation4 + $0x1], 0 }
   0x6   :  { %18 = vsyncpa [#allocation9], 0 }
   0x7   :  { %20 = vsyncpa [#allocation9 + $0x1], 0  ;;  %s933_s12 = smov 0   ;;  %s935_s13 = smov 0  }
   0x8   :  { %s937_s14 = smov 0   ;;  %s939_s15 = smov 0  }
   0x9   :  { %s941_s16 = smov 0   ;;  %s943_s17 = smov 0  }
   0xa LB: > { %s612_s18 = sadd.s32 4294967295, %s904_s17   ;;  %s613_s19 = sadd.s32 4294967294, %s904_s17   ;;  %s904_s17 = sphi %s943_s17, %s26_s17   ;;  %s900_s16 = sphi %s941_s16, %s1261_s16   ;;  %s896_s15 = sphi %s939_s15, %s1260_s15   ;;  %s892_s14 = sphi %s937_s14, %s1259_s14   ;;  %s888_s13 = sphi %s935_s13, %s1258_s13   ;;  %s884_s12 = sphi %s933_s12, %s1257_s12  }
   0xb   : > { %s38_s20 = sadd.s32 1, %s900_s16  ;;  %s47_s21 = sadd.s32 1, %s892_s14 }
   0xc   : > { %p40_p0 = scmp.ge.s32.totalorder %s38_s20, 2  ;;  %p54_p1 = scmp.ne.s32.totalorder %s892_s14, %s888_s13 }
   0xd   : > { %p55_p2 = scmp.eq.s32.totalorder %s904_s17, 0  ;;  %p60_p3 = scmp.ne.s32.totalorder %s888_s13, %s884_s12 }
   0xe   : > { %s1263_s20 = smov (%p40_p0, %s38_s20), 0  ;;  %p61_p5 = scmp.eq.s32.totalorder %s612_s18, 0 }
   0xf   : > { %p974_p4 = por %p55_p2, %p54_p1  ;;  %s42_s23 = ssub.s32 %s900_s16, %s1263_s20 }
  0x10   : > { %p112_p6 = scmp.eq.s32.totalorder %s612_s18, 1  ;;  %p45_p7 = scmp.eq.s32.totalorder %s42_s23, 0 }
  0x11   : > { %p980_p8 = por %p61_p5, %p60_p3  ;;  %p118_p10 = scmp.eq.s32.totalorder %s613_s19, 1 }
  0x12   : > { %p984_p9 = por %p112_p6, %p54_p1  ;;  %p662_p13 = scmp.lt.s32.totalorder %s904_s17, 2 }
  0x13   : > { %s1241_s24 = scalar_select %p980_p8, 1, 0 }
  0x14   : > { %s1242_s25 = scalar_select %p984_p9, 1, 0 }
  0x15   : > { %s989_s26 = scalar_select %p45_p7, %s892_s14, %s47_s21  }
  0x16   : > { %p991_p11 = por %p118_p10, %p60_p3  ;;  %s998_s28 = sand.u32 1, %s892_s14  }
  0x17   : > { %s616_s29 = sshll.u32 %s998_s28, 3  ;;  %s636_s30 = sshll.u32 %s900_s16, 7 }
  0x18   : > { %s1243_s27 = scalar_select %p991_p11, 1, 0 }
  0x19   : > { %s1005_s6 = scalar_lea.hbm %s1234_s0, %s636_s30  ;;  %s168_s7 = scalar_lea.vmem [#allocation2], %s616_s29 }
  0x1a   : > { %s178_s8 = sshll.u32 %s168_s7, 4  ;;  %p1011_p0 = pnand %p662_p13, %p974_p4  ;;  %s1007_s8 = int_to_ptr.vmem [resolvable:$true] %s178_s8 }
  0x1b   : > { %s165_s10 = scalar_lea.sflag [#allocation3], %s998_s28  ;;  %s726_s11 = scalar_lea.hbm %s1005_s6, 128 }
  0x1c   : > { %p727_p3 = scmp.ne.s32.totalorder %s1005_s6, %s726_s11  ;;  %p728_p5 = pneg %p1011_p0 }
  0x1d   : > { %s731_s21 = scalar_lea.hbm %s1234_s0, 256  ;;  %p732_p4 = scmp.lt.u32.totalorder %s1005_s6, %s1234_s0 }
  0x1e   : > { %p729_p6 = pnand %p728_p5, %p727_p3  ;;  %p733_p10 = scmp.lt.u32.totalorder %s731_s21, %s726_s11 }
  0x1f   : > { %p735_p12 = scmp.lt.u32.totalorder %s726_s11, %s1005_s6 }
  0x20   : > { %p730_p7 = pneg %p729_p6  ;;  %p734_p13 = por %p733_p10, %p732_p4 }
  0x22   : > { %p736_p1 = por %p735_p12, %p734_p13 }
  0x24   : > { %p737_p2 = pnand %p736_p1, %p730_p7 }
  0x26   : > { %740 = shalt.err (!%p737_p2)
}
  0x27   : > { %s741_s29 = scalar_lea.vmem %s1007_s8, 128  ;;  %s906_s30 = smov [#allocation2]  }
  0x28   : > { %p742_p3 = scmp.ne.s32.totalorder %s1007_s8, %s741_s29  ;;  %s746_s4 = sshll.u32 %s906_s30, 4  ;;  %s747_s4 = int_to_ptr.vmem [resolvable:$false] %s746_s4 }
  0x29   : > { %s748_s5 = scalar_lea.vmem %s747_s4, 256  ;;  %p749_p9 = scmp.lt.s32.totalorder %s1007_s8, %s747_s4 }
  0x2a   : > { %p744_p6 = pnand %p742_p3, %p728_p5  ;;  %p750_p4 = scmp.lt.s32.totalorder %s748_s5, %s741_s29 }
  0x2c   : > { %p745_p11 = pneg %p744_p6  ;;  %p751_p10 = por %p750_p4, %p749_p9 }
  0x2e   : > { %p752_p12 = pnand %p751_p10, %p745_p11 }
  0x30   : > { %755 = shalt.err (!%p752_p12)
}
  0x31   : > { %651 = dma.hbm_to_vmem [thread:$0]  (!%p1011_p0), %s1005_s6, 128, %s1007_s8, %s165_s10  }
  0x32   : > { %p1245_p1 = scmp.lt.s32.totalorder %s904_s17, 3  ;;  %p1246_p2 = scmp.ge.s32.totalorder %s904_s17, 1 }
  0x33   : > { %s619_s11 = sshll.u32 %s998_s28, 1  ;;  %s637_s18 = sshll.u32 %s900_s16, 5 }
  0x34   : > { %p1047_p7 = pnand %p1246_p2, %p1245_p1  ;;  %s1056_s22 = scalar_lea.hbm %s1235_s1, %s637_s18 }
  0x35   : > { %s189_s23 = scalar_lea.vmem [#allocation5], %s619_s11  ;;  %s186_s6 = scalar_lea.sflag [#allocation6], %s998_s28 }
  0x36   : > { %s1247_s7 = scalar_select %p1047_p7, 1, 0 }
  0x37   : > { %s199_s29 = sshll.u32 %s189_s23, 4  ;;  %s756_s8 = scalar_lea.hbm %s1056_s22, 32  ;;  %s200_s29 = int_to_ptr.vmem [resolvable:$true] %s199_s29 }
  0x38   : > { %p757_p9 = scmp.ne.s32.totalorder %s1056_s22, %s756_s8  ;;  %s761_s4 = scalar_lea.hbm %s1235_s1, 64 }
  0x39   : > { %p762_p3 = scmp.lt.u32.totalorder %s1056_s22, %s1235_s1  ;;  %p763_p6 = scmp.lt.u32.totalorder %s761_s4, %s756_s8 }
  0x3a   : > { %p759_p11 = pnand %p757_p9, %p728_p5  ;;  %p765_p10 = scmp.lt.u32.totalorder %s756_s8, %s1056_s22 }
  0x3b   : > { %p764_p4 = por %p763_p6, %p762_p3 }
  0x3c   : > { %p760_p13 = pneg %p759_p11 }
  0x3d   : > { %p766_p12 = por %p765_p10, %p764_p4 }
  0x3f   : > { %p767_p1 = pnand %p766_p12, %p760_p13 }
  0x41   : > { %770 = shalt.err (!%p767_p1)
}
  0x42   : > { %s771_s28 = scalar_lea.vmem %s200_s29, 32  ;;  %s907_s11 = smov [#allocation5]  }
  0x43   : > { %p772_p2 = scmp.ne.s32.totalorder %s200_s29, %s771_s28  ;;  %s776_s19 = sshll.u32 %s907_s11, 4  ;;  %s777_s19 = int_to_ptr.vmem [resolvable:$false] %s776_s19 }
  0x44   : > { %s778_s21 = scalar_lea.vmem %s777_s19, 64  ;;  %p779_p8 = scmp.lt.s32.totalorder %s200_s29, %s777_s19 }
  0x45   : > { %p774_p9 = pnand %p772_p2, %p728_p5  ;;  %p780_p7 = scmp.lt.s32.totalorder %s778_s21, %s771_s28 }
  0x47   : > { %p775_p11 = pneg %p774_p9  ;;  %p781_p3 = por %p780_p7, %p779_p8 }
  0x49   : > { %p782_p6 = pnand %p781_p3, %p775_p11 }
  0x4b   : > { %785 = shalt.err (!%p782_p6)
}
  0x4c   : > { %654 = dma.hbm_to_vmem [thread:$0]  (!%p1011_p0), %s1056_s22, 32, %s200_s29, %s186_s6  }
  0x4d   : > { %p1248_p13 = scmp.ne.s32.totalorder %s1247_s7, 0 }
  0x4e   : > { %s1081_s23 = sand.u32 (!%p1248_p13), 1, %s888_s13   ;;  %p1249_p5 = scmp.ne.s32.totalorder (!%p1248_p13), %s1241_s24, 0 }
  0x4f   : > { %208 = sbr.rel (%p1248_p13) target bundleno = 200 (0xc8), region = 28  ;;  %s623_s8 = sshll.u32 (!%p1248_p13), %s1081_s23, 3 }
  0x50   : > { %s211_s10 = scalar_lea.sflag (!%p1248_p13), [#allocation3], %s1081_s23  ;;  %s214_s30 = scalar_lea.vmem (!%p1248_p13), [#allocation2], %s623_s8 }
  0x56   : > { %867 = dma.done.wait (%p1249_p5), %s211_s10, 128  }
  0x57   : > { %869 = vsyncadd (%p1249_p5), %s211_s10, 4294967168  ;;  %s624_s9 = sshll.u32 %s1081_s23, 1  ;;  %s220_s7 = scalar_lea.sflag [#allocation6], %s1081_s23 }
  0x58   : > { %s223_s22 = scalar_lea.vmem [#allocation5], %s624_s9 }
  0x59   : > { %871 = dma.done.wait (%p1249_p5), %s220_s7, 32  }
  0x5a   : > { %873 = vsyncadd (%p1249_p5), %s220_s7, 4294967264  ;;  %v262_v0 = vlaneseq  ;;  %v908_v2 = vmov 1966171168   ;;  %s1099_s29 = scalar_lea.vmem [#allocation7], %s624_s9  ;;  %v909_v4 = vmov 0.0   ;;  %s1104_s6 = scalar_lea.vmem [#allocation8], %s624_s9 }
  0x5b   : > { %v393_v3 = vunpack.c.l.s4 %v908_v2  ;;  %vm273_vm1 = vcmask 1043456   ;;  %v910_v7 = vmov 1   ;;  %v268_v10 = vld [vmem:[%s214_s30] sm:$0xff]  ;;  %v269_v15 = vld [vmem:[%s223_s22] sm:$0x3]  ;;  %s638_s24 = sshll.u32 %s896_s15, 5 }
  0x5c   : > { %vm1095_vm0 = vcmp.lt.s32.totalorder %v262_v0, 256  ;;  %v1109_v5 = vshrl.u32 %v262_v0, 7  ;;  %v391_v8 = vcombine.low %v910_v7, %v910_v7  ;;  %v271_v11 = vcombine.high %v268_v10, %v268_v10  ;;  %s473_s4 = sshll.u32 %s1104_s6, 4  ;;  %s1132_s28 = scalar_lea.hbm %s1237_s3, %s638_s24  ;;  %s1134_s4 = int_to_ptr.vmem [resolvable:$true] %s473_s4 }
  0x5d   : > { %266 = vst.msk [vmem:[%s1099_s29] sm:$0x3] %vm1095_vm0, %v909_v4  ;;  %267 = vst.msk [vmem:[%s1104_s6] sm:$0x3] %vm1095_vm0, %v909_v4  ;;  %v394_v6 = vunpack.c.0.s8 %v393_v3  ;;  %v274_v12 = vsel %vm273_vm1, %v268_v10, -inf  ;;  %vm386_vm2 = vcmp.ne.s32.totalorder %v269_v15, 255 }
  0x5e   : > { %v275_v13 = vrot.slane %v274_v12, 4  ;;  %v281_v16 = vsel %vm273_vm1, %v271_v11, -inf  ;;  %s445_s11 = scalar_lea.sflag [#allocation9], %s1081_s23  ;;  %s786_s19 = scalar_lea.vmem %s1134_s4, 32 }
  0x5f   : > { %v1112_v9 = vsub.s32 %v394_v6, %v1109_v5  ;;  %v282_v18 = vrot.slane %v281_v16, 4  ;;  %p787_p8 = scmp.ne.s32.totalorder %s1134_s4, %s786_s19  ;;  %p1254_p0 = scmp.ne.s32.totalorder %s1242_s25, 0 }
  0x60   : > { %v276_v17 = vmax.f32 %v274_v12, %v275_v13  ;;  %s911_s21 = smov [#allocation8]  }
  0x61   : > { %v398_v14 = vrot.slane %v391_v8, %v1112_v9  ;;  %v283_v21 = vmax.f32 %v281_v16, %v282_v18  ;;  %p788_p7 = pnand %p787_p8, %p1254_p0  ;;  %s790_s8 = sshll.u32 %s911_s21, 4  ;;  %s791_s8 = int_to_ptr.vmem [resolvable:$false] %s790_s8 }
  0x62   : > { %v277_v20 = vrot.slane %v276_v17, 2  ;;  %s792_s10 = scalar_lea.vmem %s791_s8, 64  ;;  %p793_p10 = scmp.lt.s32.totalorder %s1134_s4, %s791_s8 }
  0x63   : > { %v405_v19 = vrot.slane %v398_v14, %v1112_v9  ;;  %v284_v25 = vrot.slane %v283_v21, 2  ;;  %p789_p4 = pneg %p788_p7  ;;  %p794_p12 = scmp.lt.s32.totalorder %s792_s10, %s786_s19 }
  0x64   : > { %v434_v22 = vld [vmem:[%s1104_s6] sm:$0x3]  ;;  %v278_v24 = vmax.f32 %v276_v17, %v277_v20 }
  0x65   : > { %vm406_vm3 = vcmp.ne.s32.totalorder %v405_v19, 0  ;;  %v285_v29 = vmax.f32 %v283_v21, %v284_v25  ;;  %p795_p1 = por %p794_p12, %p793_p10 }
  0x66   : > { %vm1121_vm4 = vmand %vm386_vm2, %vm406_vm3  ;;  %v279_v28 = vrot.slane %v278_v24, 1 }
  0x67   : > { %v627_v26 = vsel %vm1121_vm4, 1.0, %v909_v4  ;;  %v286_v31 = vrot.slane %v285_v29, 1  ;;  %p796_p2 = pnand %p795_p1, %p789_p4 }
  0x68   : > { %v437_v27 = vadd.f32 %v627_v26, %v434_v22  ;;  %v280_v30 = vmax.f32 %v278_v24, %v279_v28 }
  0x6a   : > { %438 = vst.msk [vmem:[%s1104_s6] sm:$0x3] %vm1095_vm0, %v437_v27 }
  0x6b   : > { %799 = shalt.err (!%p796_p2)
}
  0x6c   : > { %s800_s30 = scalar_lea.hbm %s1132_s28, 32  ;;  %s804_s22 = scalar_lea.hbm %s1237_s3, 64 }
  0x6d   : > { %p801_p9 = scmp.ne.s32.totalorder %s1132_s28, %s800_s30  ;;  %p805_p6 = scmp.lt.u32.totalorder %s1132_s28, %s1237_s3 }
  0x6e   : > { %p806_p13 = scmp.lt.u32.totalorder %s804_s22, %s800_s30  ;;  %p808_p8 = scmp.lt.u32.totalorder %s800_s30, %s1132_s28 }
  0x6f   : > { %p802_p11 = pnand %p801_p9, %p1254_p0 }
  0x70   : > { %p807_p5 = por %p806_p13, %p805_p6 }
  0x71   : > { %p803_p3 = pneg %p802_p11 }
  0x72   : > { %p809_p7 = por %p808_p8, %p807_p5 }
  0x74   : > { %p810_p4 = pnand %p809_p7, %p803_p3 }
  0x76   : > { %813 = shalt.err (!%p810_p4)
}
  0x77   : > { %645 = dma.vmem_to_hbm [thread:$0]  (%p1254_p0), %s1134_s4, 32, %s1132_s28, %s445_s11   ;;  %v287_v32 = vmax.f32 %v285_v29, %v286_v31  ;;  %v316_v36 = vsub.s32 0, %v1109_v5  ;;  %v320_v37 = vsub.s32 1, %v1109_v5 }
  0x78   : > { %s459_s4 = sshll.u32 %s1099_s29, 4  ;;  %s1182_s11 = scalar_lea.hbm %s1236_s2, %s638_s24  ;;  %s1184_s4 = int_to_ptr.vmem [resolvable:$true] %s459_s4 }
  0x79   : > { %v290_v33 = vcombine.low %v280_v30, %v287_v32  ;;  %v317_v38 = vrot.slane %v269_v15, %v316_v36  ;;  %v321_v39 = vrot.slane %v269_v15, %v320_v37  ;;  %s440_s19 = scalar_lea.sflag [#allocation4], %s1081_s23  ;;  %s814_s21 = scalar_lea.vmem %s1184_s4, 32 }
  0x7a   : > { %p815_p10 = scmp.ne.s32.totalorder %s1184_s4, %s814_s21  ;;  %s912_s15 = smov [#allocation7]  }
  0x7b   : > { %v292_v34 = vsub.f32 %v268_v10, %v290_v33  ;;  %vm322_vm5 = vcmp.eq.s32.totalorder %v1109_v5, %v317_v38  ;;  %vm323_vm6 = vcmp.eq.s32.totalorder %v1109_v5, %v321_v39  ;;  %s818_s8 = sshll.u32 %s912_s15, 4  ;;  %s819_s8 = int_to_ptr.vmem [resolvable:$false] %s818_s8 }
  0x7c   : > { %p816_p12 = pnand %p815_p10, %p1254_p0  ;;  %s820_s10 = scalar_lea.vmem %s819_s8, 64 }
  0x7d   : > { %v293_v35 = vmul.f32 1.442695, %v292_v34  ;;  %v325_v41 = vcombine.high %v292_v34, %v292_v34  ;;  %v327_v46 = vsel %vm322_vm5, %v292_v34, 0.0  ;;  %p821_p2 = scmp.lt.s32.totalorder %s1184_s4, %s819_s8  ;;  %p822_p9 = scmp.lt.s32.totalorder %s820_s10, %s814_s21 }
  0x7e   : > { %v329_v55 = vsel %vm273_vm1, %v327_v46, 0.0  ;;  %p817_p1 = pneg %p816_p12 }
  0x7f   : > { %716 = vpow2.f32 %v293_v35  ;;  %v328_v53 = vsel %vm323_vm6, %v325_v41, 0.0  ;;  %v330_v63 = vrot.slane %v329_v55, 4  ;;  %p823_p11 = por %p822_p9, %p821_p2 }
  0x80   : > { %v336_v60 = vsel %vm273_vm1, %v328_v53, 0.0 }
  0x81   : > { %v337_v4 = vrot.slane %v336_v60, 4  ;;  %v331_v8 = vadd.f32 %v330_v63, %v329_v55  ;;  %p824_p3 = pnand %p823_p11, %p817_p1 }
  0x83   : > { %v338_v12 = vadd.f32 %v337_v4, %v336_v60  ;;  %v332_v14 = vrot.slane %v331_v8, 2 }
  0x85   : > { %v339_v16 = vrot.slane %v338_v12, 2  ;;  %v333_v18 = vadd.f32 %v332_v14, %v331_v8 }
  0x87   : > { %v340_v20 = vadd.f32 %v339_v16, %v338_v12  ;;  %v334_v24 = vrot.slane %v333_v18, 1 }
  0x89   : > { %v717_v40 = vpop.eup %716  ;;  %v341_v28 = vrot.slane %v340_v20, 1  ;;  %v335_v31 = vadd.f32 %v334_v24, %v333_v18 }
  0x8a   : > { %v296_v42 = vcombine.high %v717_v40, %v717_v40  ;;  %v298_v43 = vsel %vm273_vm1, %v717_v40, 0.0  ;;  %v343_v44 = vsel %vm322_vm5, %v717_v40, 0.0 }
  0x8b   : > { %v299_v45 = vrot.slane %v298_v43, 4  ;;  %v345_v47 = vsel %vm273_vm1, %v343_v44, 0.0  ;;  %v342_v35 = vadd.f32 %v341_v28, %v340_v20 }
  0x8c   : > { %v305_v48 = vsel %vm273_vm1, %v296_v42, 0.0  ;;  %v344_v49 = vsel %vm323_vm6, %v296_v42, 0.0  ;;  %v346_v50 = vrot.slane %v345_v47, 4 }
  0x8d   : > { %v300_v51 = vadd.f32 %v299_v45, %v298_v43  ;;  %v306_v52 = vrot.slane %v305_v48, 4  ;;  %v352_v54 = vsel %vm273_vm1, %v344_v49, 0.0 }
  0x8e   : > { %v353_v56 = vrot.slane %v352_v54, 4  ;;  %v347_v59 = vadd.f32 %v346_v50, %v345_v47  ;;  %v408_v50 = vld [vmem:[%s1099_s29] sm:$0x3] }
  0x8f   : > { %v301_v57 = vrot.slane %v300_v51, 2  ;;  %v307_v58 = vadd.f32 %v306_v52, %v305_v48 }
  0x90   : > { %v354_v0 = vadd.f32 %v353_v56, %v352_v54  ;;  %v348_v5 = vrot.slane %v347_v59, 2 }
  0x91   : > { %v302_v61 = vadd.f32 %v301_v57, %v300_v51  ;;  %v308_v62 = vrot.slane %v307_v58, 2 }
  0x92   : > { %v355_v10 = vrot.slane %v354_v0, 2  ;;  %v349_v13 = vadd.f32 %v348_v5, %v347_v59 }
  0x93   : > { %v303_v2 = vrot.slane %v302_v61, 1  ;;  %v309_v3 = vadd.f32 %v308_v62, %v307_v58 }
  0x94   : > { %v356_v15 = vadd.f32 %v355_v10, %v354_v0  ;;  %v350_v17 = vrot.slane %v349_v13, 1 }
  0x95   : > { %v304_v6 = vadd.f32 %v303_v2, %v302_v61  ;;  %v310_v7 = vrot.slane %v309_v3, 1 }
  0x96   : > { %v357_v19 = vrot.slane %v356_v15, 1  ;;  %v351_v21 = vadd.f32 %v350_v17, %v349_v13 }
  0x97   : > { %v311_v11 = vadd.f32 %v310_v7, %v309_v3  ;;  %718 = vlog2.f32 %v304_v6 }
  0x98   : > { %720 = vrcp.f32 %v304_v6  ;;  %v358_v25 = vadd.f32 %v357_v19, %v356_v15 }
  0x99   : > { %722 = vlog2.f32 %v311_v11 }
  0x9a   : > { %724 = vrcp.f32 %v311_v11 }
  0xa1   : > { %v719_v22 = vpop.eup %718 }
  0xa2   : > { %v721_v26 = vpop.eup %720  ;;  %v360_v32 = vmul.f32 0.6931472, %v719_v22 }
  0xa3   : > { %v723_v27 = vpop.eup %722  ;;  %v367_v29 = vmul.f32 %v721_v26, %v351_v21 }
  0xa4   : > { %v725_v30 = vpop.eup %724  ;;  %v362_v36 = vmul.f32 0.6931472, %v723_v27  ;;  %v363_v39 = vsub.f32 %v335_v31, %v360_v32 }
  0xa5   : > { %v368_v33 = vmul.f32 %v725_v30, %v358_v25  ;;  %v369_v34 = vsub.f32 1.0, %v367_v29 }
  0xa6   : > { %v364_v42 = vsub.f32 %v342_v35, %v362_v36 }
  0xa7   : > { %v370_v37 = vsub.f32 1.0, %v368_v33  ;;  %v371_v38 = vmax.f32 %v369_v34, 0.0 }
  0xa9   : > { %v372_v40 = vmax.f32 %v370_v37, 0.0  ;;  %v373_v41 = vmul.f32 %v371_v38, %v371_v38 }
  0xab   : > { %v374_v43 = vmul.f32 %v372_v40, %v372_v40  ;;  %v375_v44 = vsub.f32 0.0, %v373_v41 }
  0xad   : > { %v376_v45 = vsub.f32 0.0, %v374_v43  ;;  %v377_v46 = vmul.f32 %v375_v44, %v363_v39 }
  0xaf   : > { %v378_v47 = vmul.f32 %v376_v45, %v364_v42 }
  0xb1   : > { %v411_v48 = vcombine.low %v377_v46, %v378_v47 }
  0xb3   : > { %v418_v49 = vrot.slane %v411_v48, %v1112_v9 }
  0xb5   : > { %v425_v51 = vrot.slane %v418_v49, %v1112_v9 }
  0xb7   : > { %v427_v52 = vsel %vm1121_vm4, %v425_v51, 0.0 }
  0xb8   : > { %v428_v53 = vadd.f32 %v427_v52, %v408_v50 }
  0xba   : > { %433 = vst.msk [vmem:[%s1099_s29] sm:$0x3] %vm1095_vm0, %v428_v53 }
  0xbb   : > { %827 = shalt.err (!%p824_p3)
}
  0xbc   : > { %s828_s23 = scalar_lea.hbm %s1182_s11, 32  ;;  %s832_s30 = scalar_lea.hbm %s1236_s2, 64 }
  0xbd   : > { %p829_p6 = scmp.ne.s32.totalorder %s1182_s11, %s828_s23  ;;  %p833_p8 = scmp.lt.u32.totalorder %s1182_s11, %s1236_s2 }
  0xbe   : > { %p834_p7 = scmp.lt.u32.totalorder %s832_s30, %s828_s23  ;;  %p836_p10 = scmp.lt.u32.totalorder %s828_s23, %s1182_s11 }
  0xbf   : > { %p830_p13 = pnand %p829_p6, %p1254_p0 }
  0xc0   : > { %p835_p4 = por %p834_p7, %p833_p8 }
  0xc1   : > { %p831_p5 = pneg %p830_p13 }
  0xc2   : > { %p837_p12 = por %p836_p10, %p835_p4 }
  0xc4   : > { %p838_p1 = pnand %p837_p12, %p831_p5 }
  0xc6   : > { %841 = shalt.err (!%p838_p1)
}
  0xc7   : > { %644 = dma.vmem_to_hbm [thread:$0]  (%p1254_p0), %s1184_s4, 32, %s1182_s11, %s440_s19  }
  0xc8 PF: > { %s485_s22 = sand.u32 1, %s884_s12   ;;  %p1255_p2 = scmp.ne.s32.totalorder %s1243_s27, 0 }
  0xc9   : > { %p1256_p9 = scmp.ge.s32.totalorder %s904_s17, 2  ;;  %s486_s6 = scalar_lea.sflag [#allocation4], %s485_s22 }
  0xcb   : > { %p656_p11 = pnand %p1256_p9, %p1255_p2 }
  0xcd   : > { %875 = dma.done.wait (!%p656_p11), %s486_s6, 32  }
  0xce   : > { %877 = vsyncadd (!%p656_p11), %s486_s6, 4294967264  ;;  %s495_s5 = scalar_lea.sflag [#allocation9], %s485_s22 }
  0xcf   : > { %879 = dma.done.wait (!%p656_p11), %s495_s5, 32  }
  0xd0   : > { %881 = vsyncadd (!%p656_p11), %s495_s5, 4294967264  ;;  %s26_s17 = sadd.s32 1, %s904_s17   ;;  %s1257_s12 = smov %s888_s13 }
  0xd1   : > { %p23_p3 = scmp.ge.s32.totalorder %s26_s17, 4   ;;  %s1258_s13 = smov %s892_s14 }
  0xd2   : > { %s1259_s14 = smov %s989_s26  ;;  %s1260_s15 = smov %s900_s16 }
  0xd3   : > { %s1261_s16 = smov %s1263_s20  ;;  %25 = sbr.rel (!%p23_p3) target bundleno = 10 (0xa), region = 107 }
  0xda   :  { %500 = vsyncpa [#allocation3], 1 }
  0xdb   :  { %502 = vsyncpa [#allocation3 + $0x1], 1 }
  0xdc   :  { %503 = vsyncpa [#allocation6], 1 }
  0xdd   :  { %505 = vsyncpa [#allocation6 + $0x1], 1 }
  0xde   :  { %506 = vsyncpa [#allocation4], 1 }
  0xdf   :  { %508 = vsyncpa [#allocation4 + $0x1], 1 }
  0xe0   :  { %509 = vsyncpa [#allocation9], 1 }
  0xe1   :  { %511 = vsyncpa [#allocation9 + $0x1], 1 }

</bundles_post_ra>
